<compile_context>
chip_gen: v6e
topology: v6e:2x2x1
jax: 0.10.0
libtpu: 0.0.40
codegen_flags: <defaults>
</compile_context>

<pallas_src>
import math

import jax
import jax.numpy as jnp
from jax.experimental import pallas as pl
from jax.experimental.pallas import tpu as pltpu

_LANES = 128
_SUBLANES = 8
_MAX_TILE_ROWS = 2048  # 2048 * 128 * 4 B = 1 MiB per f32 input block


def _cdiv(a, b):
    return -(-a // b)


def _round_up(a, b):
    return _cdiv(a, b) * b


def _softplus_f32(z):
    # Numerically stable softplus: log(1+exp(z)) = max(z,0) + log1p(exp(-|z|))
    return jnp.maximum(z, 0.0) + jnp.log1p(jnp.exp(-jnp.abs(z)))


def _make_kernel(rows, tile_rows, blocks_per_slice, may_be_partial):
    """Streaming-sum kernel over the (rows, 128) main slab.

    Accumulates each slice's partial sum into an (8, 128) output block that
    stays VMEM-resident across the sequential reduction axis j.
    """

    def kernel(in1_ref, in2_ref, tgt_ref, out_ref):
        s = pl.program_id(0)
        j = pl.program_id(1)

        @pl.when(j == 0)
        def _init():
            out_ref[...] = jnp.zeros_like(out_ref)

        def load_f32(ref):
            x = ref[...]
            return x if x.dtype == jnp.float32 else x.astype(jnp.float32)

        x1 = load_f32(in1_ref)
        x2 = load_f32(in2_ref)
        t = load_f32(tgt_ref)
        loss = _softplus_f32(x2 - t * x1)

        def accumulate(vals):
            # (tile_rows,128) -> (tile_rows//8, 8, 128), reduce leading axis:
            # pure vreg-wise VPU adds, no cross-lane XLU work per step.
            out_ref[...] += vals.reshape(
                tile_rows // _SUBLANES, _SUBLANES, _LANES
            ).sum(axis=0)

        if may_be_partial:
            # Logical (unclamped) block id; only exceeds the valid range for
            # the over-covered tail of the 2-slice split.
            blk = s * blocks_per_slice + j
            # NOTE: int32 row index limits rows to < 2^31 (n_elems < 2^38).
            is_partial = (blk + 1) * tile_rows > rows

            @pl.when(jnp.logical_not(is_partial))
            def _full():
                accumulate(loss)

            @pl.when(is_partial)
            def _masked():
                row = blk * tile_rows + jax.lax.broadcasted_iota(
                    jnp.int32, (tile_rows, _LANES), 0
                )
                # Select BEFORE accumulation: rows past the end hold
                # unspecified data (possibly inf/nan) from the partial DMA.
                accumulate(jnp.where(row < rows, loss, 0.0))
        else:
            accumulate(loss)

    return kernel


def soft_ranking_loss(input1, input2, target, reduction="sum",
                      max_tile_rows=_MAX_TILE_ROWS):
    if input1.shape != input2.shape or input1.shape != target.shape:
        raise ValueError("input1, input2 and target must share a shape")
    if reduction not in ("sum", "mean"):
        raise ValueError(f"unsupported reduction: {reduction}")

    n_elems = math.prod(input1.shape)
    if n_elems == 0:
        total = jnp.float32(0.0)
        return total if reduction == "sum" else total / jnp.float32(n_elems)

    rows = n_elems // _LANES          # full lane-rows in the main slab
    tail = n_elems - rows * _LANES    # 0..127 trailing elements

    x1f = jnp.ravel(input1)
    x2f = jnp.ravel(input2)
    tgf = jnp.ravel(target)

    # Tail (<128 elems): plain jnp, no full-array pad / copy of the inputs.
    if tail:
        a1 = x1f[rows * _LANES:].astype(jnp.float32)
        a2 = x2f[rows * _LANES:].astype(jnp.float32)
        tg = tgf[rows * _LANES:].astype(jnp.float32)
        tail_sum = jnp.sum(_softplus_f32(a2 - tg * a1))
    else:
        tail_sum = jnp.float32(0.0)

    if rows == 0:
        total = tail_sum
    else:
        def prep(x):
            if tail:
                # TODO(synk): XLA may still materialize this prefix slice as a
                # copy for ragged element counts; multiple-of-128 sizes (the
                # common case) are a zero-copy reshape.
                x = jax.lax.slice(x, (0,), (rows * _LANES,))
            return x.reshape(rows, _LANES)

        x1 = prep(x1f)
        x2 = prep(x2f)
        tg = prep(tgf)

        # Packed-sublane multiple: 8 for f32, 16 for bf16, 32 for int8/fp8.
        min_itemsize = min(jnp.dtype(a.dtype).itemsize for a in (x1, x2, tg))
        sub_mult = max(_SUBLANES, 32 // max(1, min_itemsize))

        tile_rows = min(max_tile_rows, _round_up(rows, sub_mult))
        tile_rows = max(sub_mult, (tile_rows // sub_mult) * sub_mult)
        total_blocks = _cdiv(rows, tile_rows)

        # Unconditional 2-slice split on the leading "parallel" axis so a
        # 2-TensorCore part (v7x) never idles a core.
        num_slices = 2 if total_blocks >= 2 else 1
        blocks_per_slice = _cdiv(total_blocks, num_slices)
        covered_blocks = num_slices * blocks_per_slice
        may_be_partial = covered_blocks * tile_rows != rows

        if covered_blocks > total_blocks:
            # Clamp so the over-covered last block of the split re-reads a
            # valid block; its contribution is masked to zero in-kernel.
            def in_index(s, j):
                return (jnp.minimum(s * blocks_per_slice + j,
                                    total_blocks - 1), 0)
        else:
            def in_index(s, j):
                return (s * blocks_per_slice + j, 0)

        in_spec = pl.BlockSpec((tile_rows, _LANES), in_index)
        # Lane-dense (8,128) partial-sum block per slice, resident across j.
        out_spec = pl.BlockSpec((_SUBLANES, _LANES), lambda s, j: (s, 0))

        n_main = rows * _LANES
        bytes_in = n_main * sum(
            jnp.dtype(a.dtype).itemsize for a in (x1, x2, tg))
        cost = pl.CostEstimate(
            flops=7 * n_main,
            transcendentals=2 * n_main,
            bytes_accessed=bytes_in + num_slices * _SUBLANES * _LANES * 4,
        )

        kernel = _make_kernel(rows, tile_rows, blocks_per_slice,
                              may_be_partial)

        partials = pl.pallas_call(
            kernel,
            out_shape=jax.ShapeDtypeStruct(
                (num_slices * _SUBLANES, _LANES), jnp.float32),
            grid_spec=pltpu.PrefetchScalarGridSpec(
                num_scalar_prefetch=0,
                grid=(num_slices, blocks_per_slice),
                in_specs=[in_spec, in_spec, in_spec],
                out_specs=out_spec,
            ),
            compiler_params=pltpu.CompilerParams(
                dimension_semantics=("parallel", "arbitrary"),
                vmem_limit_bytes=32 * 1024 * 1024,
            ),
            cost_estimate=cost,
        )(x1, x2, tg)

        # Tiny (<= 2 x 8 x 128) combine + tail; dwarfed by the streaming pass.
        total = jnp.sum(partials) + tail_sum

    if reduction == "sum":
        return total
    return total / jnp.float32(n_elems)


def _reference(input1, input2, target, reduction="sum"):
    z = (input2.astype(jnp.float32)
         - target.astype(jnp.float32) * input1.astype(jnp.float32))
    loss = jnp.logaddexp(z, 0.0)  # softplus
    return jnp.sum(loss) if reduction == "sum" else jnp.mean(loss)


if __name__ == "__main__":
    key = jax.random.PRNGKey(0)
    keys = jax.random.split(key, 12)

    def make_inputs(k0, k1, k2, shape, dtype=jnp.float32):
        a = jax.random.normal(k0, shape, dtype=jnp.float32).astype(dtype)
        b = jax.random.normal(k1, shape, dtype=jnp.float32).astype(dtype)
        t = jnp.where(jax.random.bernoulli(k2, 0.5, shape),
                      jnp.asarray(1.0, dtype), jnp.asarray(-1.0, dtype))
        return a, b, t

    def check(got, want, rtol=1e-5, atol=1e-5, name=""):
        got = jax.block_until_ready(got)
        assert jnp.allclose(got, want, rtol=rtol, atol=atol), (name, got, want)

    # Case 1: NCHW (2,4,16,16) f32 -> 2048 elems, zero-copy (16,128) slab,
    # single block, no mask.
    a1, a2, at = make_inputs(keys[0], keys[1], keys[2], (2, 4, 16, 16))
    check(soft_ranking_loss(a1, a2, at, "sum"),
          _reference(a1, a2, at, "sum"), name="case1-sum")
    check(soft_ranking_loss(a1, a2, at, "mean"),
          _reference(a1, a2, at, "mean"), name="case1-mean")

    # Case 2: ragged element count (2*3*7*11 = 462 = 3*128 + 78): kernel on
    # the (3,128) main slab (partial-tile row mask) + jnp tail, no full pad.
    b1, b2, bt = make_inputs(keys[3], keys[4], keys[5], (2, 3, 7, 11))
    check(soft_ranking_loss(b1, b2, bt, "mean"),
          _reference(b1, b2, bt, "mean"), name="case2-mean")

    # Case 3: small max_tile_rows forces 3 blocks -> unconditional 2-slice
    # split with an over-covered, clamped + masked last block.
    c1, c2, ct = make_inputs(keys[6], keys[7], keys[8], (3, 8, 128))
    check(soft_ranking_loss(c1, c2, ct, "sum", max_tile_rows=8),
          _reference(c1, c2, ct, "sum"), name="case3-sum")

    # Case 4: bf16 inputs stay bf16 in HBM (16-row sublane multiple), upcast
    # in-register inside the kernel.
    d1, d2, dt = make_inputs(keys[9], keys[10], keys[11], (4, 8, 128),
                             dtype=jnp.bfloat16)
    check(soft_ranking_loss(d1, d2, dt, "sum"),
          _reference(d1, d2, dt, "sum"),
          rtol=1e-4, atol=1e-3, name="case4-bf16-sum")

    print("KERNEL_OK")
</pallas_src>

<mosaic_0001>
module attributes {stable_mosaic.version = 11 : i64} {
  func.func @kernel(%arg0: i32, %arg1: i32, %arg2: memref<16x128xf32, #tpu.memory_space<vmem>>, %arg3: memref<16x128xf32, #tpu.memory_space<vmem>>, %arg4: memref<16x128xf32, #tpu.memory_space<vmem>>, %arg5: memref<8x128xf32, #tpu.memory_space<vmem>>) attributes {dimension_semantics = [#tpu.dimension_semantics<parallel>, #tpu.dimension_semantics<arbitrary>], iteration_bounds = array<i64: 1, 1>, scalar_prefetch = 0 : i64, scratch_operands = 0 : i64, tpu.core_type = #tpu.core_type<tc>, window_params = [{transform_indices = @transform_0, window_bounds = array<i64: 16, 128>}, {transform_indices = @transform_1, window_bounds = array<i64: 16, 128>}, {transform_indices = @transform_2, window_bounds = array<i64: 16, 128>}, {transform_indices = @transform_3, window_bounds = array<i64: 8, 128>}]} {
    %c0_i32 = arith.constant 0 : i32
    %0 = arith.cmpi eq, %arg1, %c0_i32 : i32
    %1 = arith.extui %0 : i1 to i32
    %c0_i32_0 = arith.constant 0 : i32
    %2 = arith.cmpi ne, %1, %c0_i32_0 : i32
    scf.if %2 {
      %cst_12 = arith.constant 0.000000e+00 : f32
      %21 = vector.broadcast %cst_12 : f32 to vector<8x128xf32>
      %c0_13 = arith.constant 0 : index
      %c0_14 = arith.constant 0 : index
      %22 = vector.load %arg5[%c0_13, %c0_14] : memref<8x128xf32, #tpu.memory_space<vmem>>, vector<8x128xf32>
      tpu.vector_store %arg5[%c0_13, %c0_14], %21 {strides = array<i32>} : memref<8x128xf32, #tpu.memory_space<vmem>>, vector<8x128xf32>,
    } else {
    }
    %c0 = arith.constant 0 : index
    %c0_1 = arith.constant 0 : index
    %3 = vector.load %arg2[%c0, %c0_1] : memref<16x128xf32, #tpu.memory_space<vmem>>, vector<16x128xf32>
    %c0_2 = arith.constant 0 : index
    %c0_3 = arith.constant 0 : index
    %4 = vector.load %arg3[%c0_2, %c0_3] : memref<16x128xf32, #tpu.memory_space<vmem>>, vector<16x128xf32>
    %c0_4 = arith.constant 0 : index
    %c0_5 = arith.constant 0 : index
    %5 = vector.load %arg4[%c0_4, %c0_5] : memref<16x128xf32, #tpu.memory_space<vmem>>, vector<16x128xf32>
    %6 = arith.mulf %5, %3 : vector<16x128xf32>
    %7 = arith.subf %4, %6 : vector<16x128xf32>
    %cst = arith.constant 0.000000e+00 : f32
    %8 = vector.broadcast %cst : f32 to vector<16x128xf32>
    %9 = arith.maximumf %7, %8 : vector<16x128xf32>
    %10 = math.absf %7 : vector<16x128xf32>
    %cst_6 = arith.constant 0.000000e+00 : f32
    %11 = vector.broadcast %cst_6 : f32 to vector<16x128xf32>
    %12 = arith.subf %11, %10 : vector<16x128xf32>
    %13 = math.exp %12 : vector<16x128xf32>
    %14 = math.log1p %13 : vector<16x128xf32>
    %15 = arith.addf %9, %14 : vector<16x128xf32>
    %c0_7 = arith.constant 0 : index
    %c0_8 = arith.constant 0 : index
    %16 = vector.load %arg5[%c0_7, %c0_8] : memref<8x128xf32, #tpu.memory_space<vmem>>, vector<8x128xf32>
    %17 = vector.shape_cast %15 : vector<16x128xf32> to vector<2x8x128xf32>
    %cst_9 = arith.constant dense<0.000000e+00> : vector<8x128xf32>
    %18 = vector.multi_reduction <add>, %17, %cst_9 [0] : vector<2x8x128xf32> to vector<8x128xf32>
    %19 = arith.addf %16, %18 : vector<8x128xf32>
    %c0_10 = arith.constant 0 : index
    %c0_11 = arith.constant 0 : index
    %20 = vector.load %arg5[%c0_10, %c0_11] : memref<8x128xf32, #tpu.memory_space<vmem>>, vector<8x128xf32>
    tpu.vector_store %arg5[%c0_10, %c0_11], %19 {strides = array<i32>} : memref<8x128xf32, #tpu.memory_space<vmem>>, vector<8x128xf32>,
    return
  }
  func.func @transform_0(%arg0: i32, %arg1: i32) -> (i32, i32) {
    %c1_i32 = arith.constant 1 : i32
    %0 = arith.muli %arg0, %c1_i32 : i32
    %1 = arith.addi %0, %arg1 : i32
    %c0_i32 = arith.constant 0 : i32
    %c0_i32_0 = arith.constant 0 : i32
    return %1, %c0_i32 : i32, i32
  }
  func.func @transform_1(%arg0: i32, %arg1: i32) -> (i32, i32) {
    %c1_i32 = arith.constant 1 : i32
    %0 = arith.muli %arg0, %c1_i32 : i32
    %1 = arith.addi %0, %arg1 : i32
    %c0_i32 = arith.constant 0 : i32
    %c0_i32_0 = arith.constant 0 : i32
    return %1, %c0_i32 : i32, i32
  }
  func.func @transform_2(%arg0: i32, %arg1: i32) -> (i32, i32) {
    %c1_i32 = arith.constant 1 : i32
    %0 = arith.muli %arg0, %c1_i32 : i32
    %1 = arith.addi %0, %arg1 : i32
    %c0_i32 = arith.constant 0 : i32
    %c0_i32_0 = arith.constant 0 : i32
    return %1, %c0_i32 : i32, i32
  }
  func.func @transform_3(%arg0: i32, %arg1: i32) -> (i32, i32) {
    %c0_i32 = arith.constant 0 : i32
    %c0_i32_0 = arith.constant 0 : i32
    return %arg0, %c0_i32 : i32, i32
  }
}

</mosaic_0001>

<bundles_post_ra>
// kernel: tpu_custom_call.1
= control target key start
LH: loop header
LB: loop body
LE: loop exit
PB: predicated region body
PF: predicated region fallthrough
CT: control target
= control target key end

     0   :  { %8 = vsyncpa [#allocation3], 0  ;;  %s278_s0 = inlined_call_operand.hbm [shape: f32[16,128], index: 0, kind: input, shape index: {}]   ;;  %s279_s1 = inlined_call_operand.hbm [shape: f32[16,128], index: 1, kind: input, shape index: {}]   ;;  %s280_s2 = inlined_call_operand.hbm [shape: f32[16,128], index: 2, kind: input, shape index: {}]   ;;  %s281_s3 = inlined_call_operand.hbm [shape: f32[8,128], index: 3, kind: output, shape index: {}]  }
   0x1   :  { %9 = vsyncpa [#allocation6], 0 }
   0x2   :  { %10 = vsyncpa [#allocation4], 0  ;;  %s240_s12 = smov [#allocation5]   ;;  %s241_s14 = smov [#allocation2]  }
   0x3   :  { %s36_s13 = sshll.u32 %s240_s12, 4  ;;  %s20_s15 = sshll.u32 %s241_s14, 4  ;;  %s37_s13 = int_to_ptr.vmem [resolvable:$true] %s36_s13  ;;  %s21_s15 = int_to_ptr.vmem [resolvable:$true] %s20_s15 }
   0x4   :  { %s162_s16 = scalar_lea.vmem %s37_s13, 256  ;;  %p167_p1 = scmp.lt.s32.totalorder %s37_s13, %s37_s13 }
   0x5   :  { %p163_p0 = scmp.ne.s32.totalorder %s37_s13, %s162_s16  ;;  %p168_p2 = scmp.lt.s32.totalorder %s162_s16, %s162_s16 }
   0x7   :  { %p169_p3 = por %p168_p2, %p167_p1 }
   0x9   :  { %p170_p4 = pnand %p169_p3, %p163_p0 }
   0xb   :  { %173 = shalt.err (!%p170_p4)
}
   0xc   :  { %s242_s17 = smov 128   ;;  %s243_s18 = smov 8  }
   0xd   :  { %42 = dma.hbm_to_vmem [thread:$0]  %s279_s1, 256, %s37_s13, [#allocation6], %s242_s17, %s242_s17, %s243_s18  }
   0xe   :  { %s182_s21 = scalar_lea.vmem %s21_s15, 256  ;;  %p187_p6 = scmp.lt.s32.totalorder %s21_s15, %s21_s15 }
   0xf   :  { %p183_p5 = scmp.ne.s32.totalorder %s21_s15, %s182_s21  ;;  %p188_p7 = scmp.lt.s32.totalorder %s182_s21, %s182_s21 }
  0x11   :  { %p189_p8 = por %p188_p7, %p187_p6 }
  0x13   :  { %p190_p9 = pnand %p189_p8, %p183_p5 }
  0x15   :  { %193 = shalt.err (!%p190_p9)
}
  0x16   :  { %26 = dma.hbm_to_vmem [thread:$0]  %s278_s0, 256, %s21_s15, [#allocation3], %s242_s17, %s242_s17, %s243_s18  }
  0x17   :  { %s244_s24 = smov [#allocation7]  }
  0x18   :  { %s52_s25 = sshll.u32 %s244_s24, 4  ;;  %s53_s25 = int_to_ptr.vmem [resolvable:$true] %s52_s25 }
  0x19   :  { %s202_s26 = scalar_lea.vmem %s53_s25, 256  ;;  %p207_p11 = scmp.lt.s32.totalorder %s53_s25, %s53_s25 }
  0x1a   :  { %p203_p10 = scmp.ne.s32.totalorder %s53_s25, %s202_s26  ;;  %p208_p12 = scmp.lt.s32.totalorder %s202_s26, %s202_s26 }
  0x1c   :  { %p209_p13 = por %p208_p12, %p207_p11 }
  0x1e   :  { %p210_p0 = pnand %p209_p13, %p203_p10 }
  0x20   :  { %213 = shalt.err (!%p210_p0)
}
  0x21   :  { %58 = dma.hbm_to_vmem [thread:$0]  %s280_s2, 256, %s53_s25, [#allocation6], %s242_s17, %s242_s17, %s243_s18  }
  0x22   :  { %234 = dma.done.wait [#allocation3], 256  }
  0x23   :  { %235 = vsyncadd [#allocation3], 4294967040 }
  0x24   :  { %236 = dma.done.wait [#allocation6], 512  }
  0x25   :  { %237 = vsyncadd [#allocation6], 4294966784  ;;  %v79_v0 = vld [vmem:[#allocation2] sm:$0xff]  ;;  %v80_v1 = vld [vmem:[#allocation2 + $0x8] sm:$0xff]  ;;  %s245_s0 = smov [#allocation8]  }
  0x26   :  { %v81_v2 = vld [vmem:[#allocation5] sm:$0xff]  ;;  %v82_v3 = vld [vmem:[#allocation5 + $0x8] sm:$0xff]  ;;  %v83_v4 = vld [vmem:[#allocation7] sm:$0xff]  ;;  %s129_s2 = sshll.u32 %s245_s0, 4  ;;  %s130_s2 = int_to_ptr.vmem [resolvable:$true] %s129_s2 }
  0x27   :  { %v84_v5 = vld [vmem:[#allocation7 + $0x8] sm:$0xff]  ;;  %v85_v6 = vmul.f32 %v83_v4, %v79_v0  ;;  %s214_s28 = scalar_lea.vmem %s130_s2, 128  ;;  %p219_p2 = scmp.lt.s32.totalorder %s130_s2, %s130_s2 }
  0x28   :  { %v86_v7 = vmul.f32 %v84_v5, %v80_v1  ;;  %p215_p1 = scmp.ne.s32.totalorder %s130_s2, %s214_s28  ;;  %p220_p3 = scmp.lt.s32.totalorder %s214_s28, %s214_s28 }
  0x29   :  { %v87_v8 = vsub.f32 %v81_v2, %v85_v6 }
  0x2a   :  { %v88_v9 = vsub.f32 %v82_v3, %v86_v7  ;;  %p221_p4 = por %p220_p3, %p219_p2 }
  0x2b   :  { %v91_v10 = vand.u32 2147483647, %v87_v8  ;;  %v89_v28 = vmax.f32 %v87_v8, 0.0 }
  0x2c   :  { %v92_v11 = vand.u32 2147483647, %v88_v9  ;;  %v90_v31 = vmax.f32 %v88_v9, 0.0  ;;  %p222_p5 = pnand %p221_p4, %p215_p1 }
  0x2d   :  { %v93_v12 = vsub.f32 0.0, %v91_v10 }
  0x2e   :  { %v94_v13 = vsub.f32 0.0, %v92_v11 }
  0x2f   :  { %v95_v14 = vmul.f32 1.442695, %v93_v12 }
  0x30   :  { %v97_v15 = vmul.f32 1.442695, %v94_v13 }
  0x31   :  { %146 = vpow2.f32 %v95_v14 }
  0x32   :  { %148 = vpow2.f32 %v97_v15 }
  0x3e   :  { %v147_v16 = vpop.eup %146 }
  0x3f   :  { %v149_v17 = vpop.eup %148  ;;  %v99_v18 = vadd.f32 1.0, %v147_v16  ;;  %v102_v20 = vmul.f32 -0.5, %v147_v16  ;;  %v105_v23 = vand.u32 2147483647, %v147_v16 }
  0x40   :  { %v108_v19 = vadd.f32 1.0, %v149_v17  ;;  %v111_v21 = vmul.f32 -0.5, %v149_v17  ;;  %v114_v25 = vand.u32 2147483647, %v149_v17 }
  0x41   :  { %150 = vlog2.f32 %v99_v18  ;;  %v103_v22 = vadd.f32 1.0, %v102_v20  ;;  %vm106_vm0 = vcmp.lt.f32.partialorder %v105_v23, 0.0004427343 }
  0x42   :  { %152 = vlog2.f32 %v108_v19  ;;  %v112_v24 = vadd.f32 1.0, %v111_v21  ;;  %vm115_vm1 = vcmp.lt.f32.partialorder %v114_v25, 0.0004427343 }
  0x43   :  { %v104_v26 = vmul.f32 %v147_v16, %v103_v22 }
  0x44   :  { %v113_v29 = vmul.f32 %v149_v17, %v112_v24 }
  0x4e   :  { %v151_v27 = vpop.eup %150 }
  0x4f   :  { %v153_v30 = vpop.eup %152  ;;  %v101_v32 = vmul.f32 0.6931472, %v151_v27 }
  0x50   :  { %v110_v33 = vmul.f32 0.6931472, %v153_v30 }
  0x51   :  { %v107_v34 = vsel %vm106_vm0, %v104_v26, %v101_v32 }
  0x52   :  { %v116_v35 = vsel %vm115_vm1, %v113_v29, %v110_v33  ;;  %v117_v36 = vadd.f32 %v107_v34, %v89_v28 }
  0x53   :  { %v118_v37 = vadd.f32 %v116_v35, %v90_v31 }
  0x55   :  { %v120_v38 = vadd.f32 %v118_v37, %v117_v36 }
  0x57   :  { %122 = vst [vmem:[#allocation8] sm:$0xff] %v120_v38 }
  0x58   :  { %225 = shalt.err (!%p222_p5)
}
  0x59   :  { %132 = dma.vmem_to_hbm [thread:$0]  %s130_s2, 128, %s281_s3, [#allocation4]  }
  0x5a   :  { %238 = dma.done.wait [#allocation4], 128  }
  0x5b   :  { %239 = vsyncadd [#allocation4], 4294967168 }
  0x5c   :  { %136 = vsyncpa [#allocation3], 1 }
  0x5d   :  { %137 = vsyncpa [#allocation6], 1 }
  0x5e   :  { %138 = vsyncpa [#allocation4], 1 }

</bundles_post_ra>
